<compile_context>
chip_gen: v7x
topology: tpu7x:2x2x1
jax: 0.10.0
libtpu: 0.0.40
codegen_flags: <defaults>
</compile_context>

<pallas_src>
import functools

import jax
import jax.numpy as jnp
from jax.experimental import pallas as pl
from jax.experimental.pallas import tpu as pltpu

LANE = 128                       # minor (lane) dimension of every tile
SUB = 8                          # sublane granularity
TARGET_BLOCK_BYTES = 4 * 1024 * 1024   # ~4 MiB per input block (scaled by dtype)

# Deterministic "module init": losses = [MSELoss(), L1Loss()], weight = [0.5, 0.5]
W_MSE = 0.5
W_MAE = 0.5


def _num_tensorcores():
    """2 TensorCores only on chips where a 'parallel' grid axis shards across cores."""
    try:
        kind = jax.devices()[0].device_kind.lower()
    except Exception:
        return 1
    if "v7" in kind or "v4" in kind or "v5p" in kind:
        return 2
    return 1   # v5e / v6e: single TensorCore -> a 2-wide "parallel" axis is pure overhead


def _multiple_loss_kernel(p_ref, t_ref, sq_out, ab_out, sq_acc, ab_acc, *,
                          rows, row_tile, blocks_per_core, apply_mask):
    c = pl.program_id(0)   # core slice  ("parallel")
    j = pl.program_id(1)   # reduction   ("arbitrary")

    @pl.when(j == 0)
    def _():
        sq_acc[...] = jnp.zeros_like(sq_acc)
        ab_acc[...] = jnp.zeros_like(ab_acc)

    # Cast per-tile in VMEM (free on the VPU); inputs arrive in their native dtype.
    d = p_ref[...].astype(jnp.float32) - t_ref[...].astype(jnp.float32)

    groups = row_tile // SUB   # row_tile is always a multiple of SUB

    def accumulate(dv):
        # Leading-axis partial reduce: pure vreg-wise VPU adds into (8, 128), no XLU.
        d3 = dv.reshape(groups, SUB, LANE)
        sq_acc[...] += jnp.sum(d3 * d3, axis=0)
        ab_acc[...] += jnp.sum(jnp.abs(d3), axis=0)

    if apply_mask:
        # Only the overhanging last block (or a clamped duplicate block from the
        # core split) pays the mask; interior blocks take the unmasked path.
        row0 = (c * blocks_per_core + j) * row_tile
        overhangs = row0 + row_tile > rows

        @pl.when(overhangs)
        def _():
            local = jax.lax.broadcasted_iota(jnp.int32, (row_tile, LANE), 0)
            accumulate(jnp.where(row0 + local < rows, d, 0.0))

        @pl.when(jnp.logical_not(overhangs))
        def _():
            accumulate(d)
    else:
        accumulate(d)

    # Emit lane-dense (1, 8, 128) partials once per core slice; final reduce in wrapper.
    @pl.when(j == pl.num_programs(1) - 1)
    def _():
        sq_out[...] = sq_acc[...].reshape(1, SUB, LANE)
        ab_out[...] = ab_acc[...].reshape(1, SUB, LANE)


def multiple_loss(predict, target):
    """Weighted (0.5 * MSE + 0.5 * L1) over all elements, as in MultipleLoss."""
    assert predict.shape == target.shape
    n = predict.size
    inv_n = 1.0 / float(n)

    p_flat = predict.reshape(-1)
    t_flat = target.reshape(-1)

    # Align the kernel's view to a multiple of SUB * LANE (= 1024) elements; the
    # (< 1024-element) tail is reduced by XLA in the wrapper -> no full-array pad.
    chunk = SUB * LANE
    n_main = (n // chunk) * chunk

    if n_main != n:
        dt = p_flat[n_main:].astype(jnp.float32) - t_flat[n_main:].astype(jnp.float32)
        tail_sq = jnp.sum(dt * dt)
        tail_ab = jnp.sum(jnp.abs(dt))
    else:
        tail_sq = jnp.float32(0.0)
        tail_ab = jnp.float32(0.0)

    if n_main == 0:
        # Entire input is smaller than one (8, 128) tile: wrapper math only.
        mse = tail_sq * inv_n
        mae = tail_ab * inv_n
        return W_MSE * mse + W_MAE * mae

    if n_main != n:
        p_main = p_flat[:n_main]
        t_main = t_flat[:n_main]
    else:
        p_main = p_flat
        t_main = t_flat

    rows = n_main // LANE          # always a multiple of SUB
    p2 = p_main.reshape(rows, LANE)
    t2 = t_main.reshape(rows, LANE)

    # Block sizing: ~4 MiB per input block regardless of dtype (f32 -> 8192 rows,
    # bf16 -> 16384 rows), never larger than the array.
    dtype_bytes = max(1, jnp.dtype(predict.dtype).itemsize)
    max_rows = max(SUB, (TARGET_BLOCK_BYTES // (LANE * dtype_bytes)) // SUB * SUB)
    row_tile = min(max_rows, rows)
    num_blocks = pl.cdiv(rows, row_tile)

    # Core split: only on multi-TC chips, and never more cores than blocks.
    ncores = min(_num_tensorcores(), num_blocks)
    blocks_per_core = pl.cdiv(num_blocks, ncores)
    max_blk = num_blocks - 1
    # Mask needed iff some (core, step) pair sees rows beyond the array (either the
    # genuinely partial last block, or a clamped duplicate block on the last core).
    apply_mask = (ncores * blocks_per_core * row_tile) != rows
    assert apply_mask or (
        ncores * blocks_per_core == num_blocks and num_blocks * row_tile == rows
    ), "tiling must exactly cover the array whenever masking is disabled"

    kernel = functools.partial(
        _multiple_loss_kernel,
        rows=rows,
        row_tile=row_tile,
        blocks_per_core=blocks_per_core,
        apply_mask=apply_mask,
    )

    def in_map(c, j):
        # Clamp so a core slice with no remaining blocks re-reads the last valid
        # block (its contribution is fully masked to zero in the kernel).
        return (jnp.minimum(c * blocks_per_core + j, max_blk), 0)

    sq_part, ab_part = pl.pallas_call(
        kernel,
        out_shape=(
            jax.ShapeDtypeStruct((ncores, SUB, LANE), jnp.float32),
            jax.ShapeDtypeStruct((ncores, SUB, LANE), jnp.float32),
        ),
        grid_spec=pltpu.PrefetchScalarGridSpec(
            num_scalar_prefetch=0,
            grid=(ncores, blocks_per_core),
            in_specs=[
                pl.BlockSpec((row_tile, LANE), in_map),
                pl.BlockSpec((row_tile, LANE), in_map),
            ],
            out_specs=(
                pl.BlockSpec((1, SUB, LANE), lambda c, j: (c, 0, 0)),
                pl.BlockSpec((1, SUB, LANE), lambda c, j: (c, 0, 0)),
            ),
            scratch_shapes=[
                pltpu.VMEM((SUB, LANE), jnp.float32),  # partial sum of squared diffs
                pltpu.VMEM((SUB, LANE), jnp.float32),  # partial sum of abs diffs
            ],
        ),
        compiler_params=pltpu.CompilerParams(
            dimension_semantics=("parallel", "arbitrary"),
            vmem_limit_bytes=48 * 1024 * 1024,
        ),
    )(p2, t2)

    sum_sq = jnp.sum(sq_part) + tail_sq
    sum_ab = jnp.sum(ab_part) + tail_ab
    mse = sum_sq * inv_n
    mae = sum_ab * inv_n
    return W_MSE * mse + W_MAE * mae


if __name__ == "__main__":
    key = jax.random.PRNGKey(0)
    k1, k2 = jax.random.split(key)
    # NCHW, small shapes: batch=2, channels=4, spatial=16
    predict = jax.random.normal(k1, (2, 4, 16, 16), dtype=jnp.float32)
    target = jax.random.normal(k2, (2, 4, 16, 16), dtype=jnp.float32)

    loss = multiple_loss(predict, target)
    loss = jax.block_until_ready(loss)

    # pure-JAX reference of MultipleLoss([MSE, L1], weight=[0.5, 0.5])
    d = predict - target
    ref = W_MSE * jnp.mean(d * d) + W_MAE * jnp.mean(jnp.abs(d))

    assert jnp.allclose(loss, ref, rtol=1e-5, atol=1e-6), (loss, ref)
    print("KERNEL_OK")
</pallas_src>

<mosaic_0001>
module attributes {stable_mosaic.version = 11 : i64} {
  func.func @_multiple_loss_kernel(%arg0: i32, %arg1: i32, %arg2: memref<16x128xf32, #tpu.memory_space<vmem>>, %arg3: memref<16x128xf32, #tpu.memory_space<vmem>>, %arg4: memref<1x8x128xf32, #tpu.memory_space<vmem>>, %arg5: memref<1x8x128xf32, #tpu.memory_space<vmem>>, %arg6: memref<8x128xf32, #tpu.memory_space<vmem>>, %arg7: memref<8x128xf32, #tpu.memory_space<vmem>>) attributes {dimension_semantics = [#tpu.dimension_semantics<parallel>, #tpu.dimension_semantics<arbitrary>], iteration_bounds = array<i64: 1, 1>, scalar_prefetch = 0 : i64, scratch_operands = 2 : i64, tpu.core_type = #tpu.core_type<tc>, window_params = [{transform_indices = @transform_0, window_bounds = array<i64: 16, 128>}, {transform_indices = @transform_1, window_bounds = array<i64: 16, 128>}, {transform_indices = @transform_2, window_bounds = array<i64: 1, 8, 128>}, {transform_indices = @transform_3, window_bounds = array<i64: 1, 8, 128>}]} {
    %c0_i32 = arith.constant 0 : i32
    %0 = arith.cmpi eq, %arg1, %c0_i32 : i32
    %1 = arith.extui %0 : i1 to i32
    %c0_i32_0 = arith.constant 0 : i32
    %2 = arith.cmpi ne, %1, %c0_i32_0 : i32
    scf.if %2 {
      %cst_15 = arith.constant 0.000000e+00 : f32
      %20 = vector.broadcast %cst_15 : f32 to vector<8x128xf32>
      %c0_16 = arith.constant 0 : index
      %c0_17 = arith.constant 0 : index
      %21 = vector.load %arg6[%c0_16, %c0_17] : memref<8x128xf32, #tpu.memory_space<vmem>>, vector<8x128xf32>
      tpu.vector_store %arg6[%c0_16, %c0_17], %20 {strides = array<i32>} : memref<8x128xf32, #tpu.memory_space<vmem>>, vector<8x128xf32>,
      %cst_18 = arith.constant 0.000000e+00 : f32
      %22 = vector.broadcast %cst_18 : f32 to vector<8x128xf32>
      %c0_19 = arith.constant 0 : index
      %c0_20 = arith.constant 0 : index
      %23 = vector.load %arg7[%c0_19, %c0_20] : memref<8x128xf32, #tpu.memory_space<vmem>>, vector<8x128xf32>
      tpu.vector_store %arg7[%c0_19, %c0_20], %22 {strides = array<i32>} : memref<8x128xf32, #tpu.memory_space<vmem>>, vector<8x128xf32>,
    } else {
    }
    %c0 = arith.constant 0 : index
    %c0_1 = arith.constant 0 : index
    %3 = vector.load %arg2[%c0, %c0_1] : memref<16x128xf32, #tpu.memory_space<vmem>>, vector<16x128xf32>
    %c0_2 = arith.constant 0 : index
    %c0_3 = arith.constant 0 : index
    %4 = vector.load %arg3[%c0_2, %c0_3] : memref<16x128xf32, #tpu.memory_space<vmem>>, vector<16x128xf32>
    %5 = arith.subf %3, %4 : vector<16x128xf32>
    %6 = vector.shape_cast %5 : vector<16x128xf32> to vector<2x8x128xf32>
    %c0_4 = arith.constant 0 : index
    %c0_5 = arith.constant 0 : index
    %7 = vector.load %arg6[%c0_4, %c0_5] : memref<8x128xf32, #tpu.memory_space<vmem>>, vector<8x128xf32>
    %8 = arith.mulf %6, %6 : vector<2x8x128xf32>
    %cst = arith.constant dense<0.000000e+00> : vector<8x128xf32>
    %9 = vector.multi_reduction <add>, %8, %cst [0] : vector<2x8x128xf32> to vector<8x128xf32>
    %10 = arith.addf %7, %9 : vector<8x128xf32>
    %c0_6 = arith.constant 0 : index
    %c0_7 = arith.constant 0 : index
    %11 = vector.load %arg6[%c0_6, %c0_7] : memref<8x128xf32, #tpu.memory_space<vmem>>, vector<8x128xf32>
    tpu.vector_store %arg6[%c0_6, %c0_7], %10 {strides = array<i32>} : memref<8x128xf32, #tpu.memory_space<vmem>>, vector<8x128xf32>,
    %c0_8 = arith.constant 0 : index
    %c0_9 = arith.constant 0 : index
    %12 = vector.load %arg7[%c0_8, %c0_9] : memref<8x128xf32, #tpu.memory_space<vmem>>, vector<8x128xf32>
    %13 = math.absf %6 : vector<2x8x128xf32>
    %cst_10 = arith.constant dense<0.000000e+00> : vector<8x128xf32>
    %14 = vector.multi_reduction <add>, %13, %cst_10 [0] : vector<2x8x128xf32> to vector<8x128xf32>
    %15 = arith.addf %12, %14 : vector<8x128xf32>
    %c0_11 = arith.constant 0 : index
    %c0_12 = arith.constant 0 : index
    %16 = vector.load %arg7[%c0_11, %c0_12] : memref<8x128xf32, #tpu.memory_space<vmem>>, vector<8x128xf32>
    tpu.vector_store %arg7[%c0_11, %c0_12], %15 {strides = array<i32>} : memref<8x128xf32, #tpu.memory_space<vmem>>, vector<8x128xf32>,
    %c0_i32_13 = arith.constant 0 : i32
    %17 = arith.cmpi eq, %arg1, %c0_i32_13 : i32
    %18 = arith.extui %17 : i1 to i32
    %c0_i32_14 = arith.constant 0 : i32
    %19 = arith.cmpi ne, %18, %c0_i32_14 : i32
    scf.if %19 {
      %c0_15 = arith.constant 0 : index
      %c0_16 = arith.constant 0 : index
      %20 = vector.load %arg6[%c0_15, %c0_16] : memref<8x128xf32, #tpu.memory_space<vmem>>, vector<8x128xf32>
      %21 = vector.shape_cast %20 : vector<8x128xf32> to vector<1x8x128xf32>
      %c0_17 = arith.constant 0 : index
      %c0_18 = arith.constant 0 : index
      %c0_19 = arith.constant 0 : index
      %22 = vector.load %arg4[%c0_17, %c0_18, %c0_19] : memref<1x8x128xf32, #tpu.memory_space<vmem>>, vector<1x8x128xf32>
      tpu.vector_store %arg4[%c0_17, %c0_18, %c0_19], %21 {strides = array<i32>} : memref<1x8x128xf32, #tpu.memory_space<vmem>>, vector<1x8x128xf32>,
      %c0_20 = arith.constant 0 : index
      %c0_21 = arith.constant 0 : index
      %23 = vector.load %arg7[%c0_20, %c0_21] : memref<8x128xf32, #tpu.memory_space<vmem>>, vector<8x128xf32>
      %24 = vector.shape_cast %23 : vector<8x128xf32> to vector<1x8x128xf32>
      %c0_22 = arith.constant 0 : index
      %c0_23 = arith.constant 0 : index
      %c0_24 = arith.constant 0 : index
      %25 = vector.load %arg5[%c0_22, %c0_23, %c0_24] : memref<1x8x128xf32, #tpu.memory_space<vmem>>, vector<1x8x128xf32>
      tpu.vector_store %arg5[%c0_22, %c0_23, %c0_24], %24 {strides = array<i32>} : memref<1x8x128xf32, #tpu.memory_space<vmem>>, vector<1x8x128xf32>,
    } else {
    }
    return
  }
  func.func @transform_0(%arg0: i32, %arg1: i32) -> (i32, i32) {
    %c1_i32 = arith.constant 1 : i32
    %0 = arith.muli %arg0, %c1_i32 : i32
    %1 = arith.addi %0, %arg1 : i32
    %c0_i32 = arith.constant 0 : i32
    %2 = arith.minsi %1, %c0_i32 : i32
    %c0_i32_0 = arith.constant 0 : i32
    %c0_i32_1 = arith.constant 0 : i32
    return %2, %c0_i32_0 : i32, i32
  }
  func.func @transform_1(%arg0: i32, %arg1: i32) -> (i32, i32) {
    %c1_i32 = arith.constant 1 : i32
    %0 = arith.muli %arg0, %c1_i32 : i32
    %1 = arith.addi %0, %arg1 : i32
    %c0_i32 = arith.constant 0 : i32
    %2 = arith.minsi %1, %c0_i32 : i32
    %c0_i32_0 = arith.constant 0 : i32
    %c0_i32_1 = arith.constant 0 : i32
    return %2, %c0_i32_0 : i32, i32
  }
  func.func @transform_2(%arg0: i32, %arg1: i32) -> (i32, i32, i32) {
    %c0_i32 = arith.constant 0 : i32
    %c0_i32_0 = arith.constant 0 : i32
    %c0_i32_1 = arith.constant 0 : i32
    return %arg0, %c0_i32, %c0_i32_0 : i32, i32, i32
  }
  func.func @transform_3(%arg0: i32, %arg1: i32) -> (i32, i32, i32) {
    %c0_i32 = arith.constant 0 : i32
    %c0_i32_0 = arith.constant 0 : i32
    %c0_i32_1 = arith.constant 0 : i32
    return %arg0, %c0_i32, %c0_i32_0 : i32, i32, i32
  }
}

</mosaic_0001>

<bundles_post_ra>
// kernel: tpu_custom_call.1
= control target key start
LH: loop header
LB: loop body
LE: loop exit
PB: predicated region body
PF: predicated region fallthrough
CT: control target
= control target key end

     0   :  { %9 = vsyncpa [#allocation5], 0  ;;  %s304_s0 = inlined_call_operand.hbm [shape: f32[16,128], index: 0, kind: input, shape index: {}]   ;;  %s305_s1 = inlined_call_operand.hbm [shape: f32[16,128], index: 1, kind: input, shape index: {}]   ;;  %s306_s2 = inlined_call_operand.hbm [shape: f32[1,8,128], index: 2, kind: output, shape index: {0}]   ;;  %s307_s3 = inlined_call_operand.hbm [shape: f32[1,8,128], index: 3, kind: output, shape index: {1}]  }
   0x1   :  { %10 = vsyncpa [#allocation8], 0 }
   0x2   :  { %11 = vsyncpa [#allocation6], 0 }
   0x3   :  { %12 = vsyncpa [#allocation11], 0  ;;  %s230_s12 = smov [#allocation4]   ;;  %s134_s16 = scalar_lea.hbm %s304_s0, 256 }
   0x4   :  { %s24_s13 = sshll.u32 %s230_s12, 4  ;;  %p135_p0 = scmp.ne.s32.totalorder %s304_s0, %s134_s16  ;;  %s25_s13 = int_to_ptr.vmem [resolvable:$true] %s24_s13 }
   0x5   :  { %p138_p1 = scmp.lt.u32.totalorder %s134_s16, %s304_s0 }
   0x7   :  { %p140_p2 = pnand %p138_p1, %p135_p0 }
   0x9   :  { %143 = shalt.err (!%p140_p2)
}
   0xa   :  { %s144_s21 = scalar_lea.vmem %s25_s13, 256  ;;  %p149_p4 = scmp.lt.s32.totalorder %s25_s13, %s25_s13 }
   0xb   :  { %p145_p3 = scmp.ne.s32.totalorder %s25_s13, %s144_s21  ;;  %p150_p5 = scmp.lt.s32.totalorder %s144_s21, %s144_s21 }
   0xd   :  { %p151_p6 = por %p150_p5, %p149_p4 }
   0xf   :  { %p152_p7 = pnand %p151_p6, %p145_p3 }
  0x11   :  { %155 = shalt.err (!%p152_p7)
}
  0x12   :  { %s231_s22 = smov 128   ;;  %s232_s23 = smov 8  }
  0x13   :  { %30 = dma.hbm_to_vmem [thread:$0]  %s304_s0, 256, %s25_s13, [#allocation5], %s231_s22, %s231_s22, %s232_s23  }
  0x14   :  { %s233_s26 = smov [#allocation7]   ;;  %s156_s30 = scalar_lea.hbm %s305_s1, 256 }
  0x15   :  { %s42_s27 = sshll.u32 %s233_s26, 4  ;;  %p157_p8 = scmp.ne.s32.totalorder %s305_s1, %s156_s30  ;;  %s43_s27 = int_to_ptr.vmem [resolvable:$true] %s42_s27 }
  0x16   :  { %p160_p9 = scmp.lt.u32.totalorder %s156_s30, %s305_s1 }
  0x18   :  { %p162_p10 = pnand %p160_p9, %p157_p8 }
  0x1a   :  { %165 = shalt.err (!%p162_p10)
}
  0x1b   :  { %s166_s8 = scalar_lea.vmem %s43_s27, 256  ;;  %p171_p12 = scmp.lt.s32.totalorder %s43_s27, %s43_s27 }
  0x1c   :  { %p167_p11 = scmp.ne.s32.totalorder %s43_s27, %s166_s8  ;;  %p172_p13 = scmp.lt.s32.totalorder %s166_s8, %s166_s8 }
  0x1e   :  { %p173_p0 = por %p172_p13, %p171_p12 }
  0x20   :  { %p174_p1 = pnand %p173_p0, %p167_p11 }
  0x22   :  { %177 = shalt.err (!%p174_p1)
}
  0x23   :  { %48 = dma.hbm_to_vmem [thread:$0]  %s305_s1, 256, %s43_s27, [#allocation8], %s231_s22, %s231_s22, %s232_s23  }
  0x24   :  { %222 = dma.done.wait [#allocation5], 256  }
  0x25   :  { %223 = vsyncadd [#allocation5], 4294967040 }
  0x26   :  { %224 = dma.done.wait [#allocation8], 256  }
  0x27   :  { %225 = vsyncadd [#allocation8], 4294967040  ;;  %v69_v0 = vld [vmem:[#allocation4] sm:$0xff]  ;;  %v70_v1 = vld [vmem:[#allocation4 + $0x8] sm:$0xff]  ;;  %s234_s10 = smov [#allocation9]   ;;  %s235_s12 = smov [#allocation10]  }
  0x28   :  { %v71_v2 = vld [vmem:[#allocation7] sm:$0xff]  ;;  %v72_v3 = vld [vmem:[#allocation7 + $0x8] sm:$0xff]  ;;  %s100_s11 = sshll.u32 %s234_s10, 4  ;;  %s110_s13 = sshll.u32 %s235_s12, 4  ;;  %s101_s11 = int_to_ptr.vmem [resolvable:$true] %s100_s11  ;;  %s111_s13 = int_to_ptr.vmem [resolvable:$true] %s110_s13 }
  0x29   :  { %v73_v4 = vsub.f32 %v69_v0, %v71_v2  ;;  %v74_v5 = vsub.f32 %v70_v1, %v72_v3  ;;  %s178_s1 = scalar_lea.vmem %s101_s11, 128  ;;  %p183_p3 = scmp.lt.s32.totalorder %s101_s11, %s101_s11 }
  0x2a   :  { %p179_p2 = scmp.ne.s32.totalorder %s101_s11, %s178_s1  ;;  %p184_p4 = scmp.lt.s32.totalorder %s178_s1, %s178_s1 }
  0x2b   :  { %v76_v6 = vmul.f32 %v73_v4, %v73_v4  ;;  %v82_v7 = vand.u32 2147483647, %v73_v4  ;;  %v77_v8 = vmul.f32 %v74_v5, %v74_v5  ;;  %v83_v9 = vand.u32 2147483647, %v74_v5 }
  0x2c   :  { %p185_p5 = por %p184_p4, %p183_p3 }
  0x2d   :  { %v78_v10 = vadd.f32 %v77_v8, %v76_v6  ;;  %v84_v11 = vadd.f32 %v83_v9, %v82_v7 }
  0x2e   :  { %p186_p6 = pnand %p185_p5, %p179_p2 }
  0x2f   :  { %91 = vst [vmem:[#allocation9] sm:$0xff] %v78_v10  ;;  %93 = vst [vmem:[#allocation10] sm:$0xff] %v84_v11 }
  0x30   :  { %189 = shalt.err (!%p186_p6)
}
  0x31   :  { %s190_s16 = scalar_lea.hbm %s306_s2, 128 }
  0x32   :  { %p191_p7 = scmp.ne.s32.totalorder %s306_s2, %s190_s16  ;;  %p194_p8 = scmp.lt.u32.totalorder %s190_s16, %s306_s2 }
  0x34   :  { %p196_p9 = pnand %p194_p8, %p191_p7 }
  0x36   :  { %199 = shalt.err (!%p196_p9)
}
  0x37   :  { %103 = dma.vmem_to_hbm [thread:$0]  %s101_s11, 128, %s306_s2, [#allocation6]  }
  0x38   :  { %s200_s23 = scalar_lea.vmem %s111_s13, 128  ;;  %p205_p11 = scmp.lt.s32.totalorder %s111_s13, %s111_s13 }
  0x39   :  { %p201_p10 = scmp.ne.s32.totalorder %s111_s13, %s200_s23  ;;  %p206_p12 = scmp.lt.s32.totalorder %s200_s23, %s200_s23 }
  0x3b   :  { %p207_p13 = por %p206_p12, %p205_p11 }
  0x3d   :  { %p208_p0 = pnand %p207_p13, %p201_p10 }
  0x3f   :  { %211 = shalt.err (!%p208_p0)
}
  0x40   :  { %s212_s26 = scalar_lea.hbm %s307_s3, 128 }
  0x41   :  { %p213_p1 = scmp.ne.s32.totalorder %s307_s3, %s212_s26  ;;  %p216_p2 = scmp.lt.u32.totalorder %s212_s26, %s307_s3 }
  0x43   :  { %p218_p3 = pnand %p216_p2, %p213_p1 }
  0x45   :  { %221 = shalt.err (!%p218_p3)
}
  0x46   :  { %113 = dma.vmem_to_hbm [thread:$0]  %s111_s13, 128, %s307_s3, [#allocation11]  }
  0x47   :  { %226 = dma.done.wait [#allocation6], 128  }
  0x48   :  { %227 = vsyncadd [#allocation6], 4294967168 }
  0x49   :  { %228 = dma.done.wait [#allocation11], 128  }
  0x4a   :  { %229 = vsyncadd [#allocation11], 4294967168 }
  0x4b   :  { %120 = vsyncpa [#allocation5], 1 }
  0x4c   :  { %121 = vsyncpa [#allocation8], 1 }
  0x4d   :  { %122 = vsyncpa [#allocation6], 1 }
  0x4e   :  { %123 = vsyncpa [#allocation11], 1 }

</bundles_post_ra>
